<compile_context>
chip_gen: v6e
topology: v6e:2x2x1
jax: 0.10.0
libtpu: 0.0.40
codegen_flags: <defaults>
</compile_context>

<pallas_src>
import jax
import jax.numpy as jnp
from jax.experimental import pallas as pl
from jax.experimental.pallas import tpu as pltpu

_LANE = 128
_MIB = 1 << 20
_TARGET_BLOCK_BYTES = 1 << 20  # ~1 MiB per block buffer (near-roofline tiling)


def _identity_kernel(x_ref, o_ref):
    # Pure passthrough copy of the current tile.
    o_ref[...] = x_ref[...]


def _sublane_multiple(dtype) -> int:
    # Second-to-last block dim must be a multiple of the dtype's sublane
    # packing: 8 for 32-bit, 16 for bf16/fp16, 32 for int8/fp8.
    itemsize = jnp.dtype(dtype).itemsize
    return 8 * max(1, 4 // itemsize)


def mapping_net_forward(x: jax.Array) -> jax.Array:
    """Pallas implementation of MappingNet.forward (identity)."""
    total = x.size
    if total == 0 or total % _LANE != 0:
        # Identity semantics: cheapest correct path is a no-op (no pad/slice).
        # TODO(synk): masked final-tile Pallas copy for totals not divisible by 128.
        return x

    dtype = x.dtype
    itemsize = jnp.dtype(dtype).itemsize

    # Widest lane-dense last dim that divides the element count exactly:
    # wide unmasked stores + long contiguous DMA descriptors, zero padding.
    width = _LANE
    for w in (4096, 2048, 1024, 512, 256):
        if total % w == 0:
            width = w
            break
    rows = total // width

    sub = _sublane_multiple(dtype)
    rows_per_block = max(sub, _TARGET_BLOCK_BYTES // (width * itemsize))
    rows_per_block = (rows_per_block // sub) * sub
    if rows <= rows_per_block:
        block_rows = rows                 # full extent: always a legal block shape
        grid = (1,)
    else:
        block_rows = rows_per_block
        grid = (pl.cdiv(rows, block_rows),)  # ragged last block is masked by Pallas

    block_bytes = block_rows * width * itemsize
    # in + out, double-buffered, plus headroom; capped to fit v7x's 64 MiB VMEM.
    vmem_limit = int(min(32 * _MIB, max(4 * _MIB, 6 * block_bytes)))

    x2d = x.reshape(rows, width)  # contiguous reshape -> bitcast under jit

    out2d = pl.pallas_call(
        _identity_kernel,
        out_shape=jax.ShapeDtypeStruct((rows, width), dtype),
        grid=grid,
        in_specs=[pl.BlockSpec((block_rows, width), lambda i: (i, 0))],
        out_specs=pl.BlockSpec((block_rows, width), lambda i: (i, 0)),
        # Output written in place over the input buffer; callers that donate
        # the input get a true in-place pass with no extra HBM allocation.
        input_output_aliases={0: 0},
        compiler_params=pltpu.CompilerParams(
            # "parallel" lets the row grid shard across v7x's two TensorCores
            # (harmless on single-TC v5e/v6e).
            dimension_semantics=("parallel",),
            vmem_limit_bytes=vmem_limit,
        ),
        # NOTE: on v6e, if profiling shows exposed DMA, pipeline_mode=pl.Buffered(3)
        # on the in/out specs is safe (128 MiB VMEM); recheck footprint on v7x first.
    )(x2d)

    return out2d.reshape(x.shape)


if __name__ == "__main__":
    key = jax.random.PRNGKey(0)
    shape, dtype = (2, 4, 16, 16), jnp.float32

    x = jax.random.normal(key, shape, dtype=dtype)
    # Independent reference (same key -> same values, distinct buffer) so we can
    # donate x's buffer below and still verify the result.
    x_ref = jax.random.normal(key, shape, dtype=dtype)

    fwd = jax.jit(mapping_net_forward, donate_argnums=0)
    y = jax.block_until_ready(fwd(x))

    assert y.shape == x_ref.shape
    assert y.dtype == x_ref.dtype
    assert bool(jnp.all(y == x_ref))

    print("KERNEL_OK")
</pallas_src>

<mosaic_0001>
module attributes {stable_mosaic.version = 11 : i64} {
  func.func @_identity_kernel(%arg0: i32, %arg1: memref<1x2048xf32, #tpu.memory_space<vmem>>, %arg2: memref<1x2048xf32, #tpu.memory_space<vmem>>) attributes {dimension_semantics = [#tpu.dimension_semantics<parallel>], iteration_bounds = array<i64: 1>, scalar_prefetch = 0 : i64, scratch_operands = 0 : i64, tpu.core_type = #tpu.core_type<tc>, window_params = [{transform_indices = @transform_0, window_bounds = array<i64: 1, 2048>}, {transform_indices = @transform_1, window_bounds = array<i64: 1, 2048>}]} {
    %c0 = arith.constant 0 : index
    %c0_0 = arith.constant 0 : index
    %0 = vector.load %arg1[%c0, %c0_0] : memref<1x2048xf32, #tpu.memory_space<vmem>>, vector<1x2048xf32>
    %c0_1 = arith.constant 0 : index
    %c0_2 = arith.constant 0 : index
    %1 = vector.load %arg2[%c0_1, %c0_2] : memref<1x2048xf32, #tpu.memory_space<vmem>>, vector<1x2048xf32>
    tpu.vector_store %arg2[%c0_1, %c0_2], %0 {strides = array<i32>} : memref<1x2048xf32, #tpu.memory_space<vmem>>, vector<1x2048xf32>,
    return
  }
  func.func @transform_0(%arg0: i32) -> (i32, i32) {
    %c0_i32 = arith.constant 0 : i32
    %c0_i32_0 = arith.constant 0 : i32
    return %arg0, %c0_i32 : i32, i32
  }
  func.func @transform_1(%arg0: i32) -> (i32, i32) {
    %c0_i32 = arith.constant 0 : i32
    %c0_i32_0 = arith.constant 0 : i32
    return %arg0, %c0_i32 : i32, i32
  }
}

</mosaic_0001>

<bundles_post_ra>
// kernel: mapping_net_forward.1
= control target key start
LH: loop header
LB: loop body
LE: loop exit
PB: predicated region body
PF: predicated region fallthrough
CT: control target
= control target key end

     0   :  { %s38_s0 = inlined_call_operand.vmem [shape: f32[1,2048], index: 0, kind: input, shape index: {}, may-alias: {0,1}]   ;;  %s39_s1 = inlined_call_operand.vmem [shape: f32[1,2048], index: 1, kind: output, shape index: {}, may-alias: {0,1}]  }
   0x1   :  { %v8_v0 = vld [vmem:[%s38_s0] sm:$0xff]  ;;  %v9_v1 = vld [vmem:[%s38_s0 + $0x8] sm:$0xff] }
   0x2   :  { %10 = vst [vmem:[%s39_s1] sm:$0xff] %v8_v0  ;;  %11 = vst [vmem:[%s39_s1 + $0x8] sm:$0xff] %v9_v1 }

</bundles_post_ra>
